<compile_context>
chip_gen: v7x
topology: tpu7x:2x2x1
jax: 0.10.0
libtpu: 0.0.40
codegen_flags: <defaults>
</compile_context>

<pallas_src>
import functools

import numpy as np
import jax
import jax.numpy as jnp
from jax.experimental import pallas as pl
from jax.experimental.pallas import tpu as pltpu

EDGE = tuple((np.array([0, 10, 20, 30, 40, 50, 100], dtype=np.float32) / 100.0).tolist())
WEIGHTS = tuple(np.array([0, 1, 2, 3, 4, 5], dtype=np.float32).tolist())
_LANES = 128


def _weight_and_valid(y):
    """Closed-form per-element weight and validity mask (f32 inputs)."""
    valid = (y >= EDGE[0]) & (y < EDGE[-1])
    weight = jnp.full(y.shape, WEIGHTS[0], jnp.float32)
    for k in range(1, len(WEIGHTS)):
        delta = float(WEIGHTS[k] - WEIGHTS[k - 1])
        weight = weight + delta * (y >= EDGE[k]).astype(jnp.float32)
    return weight, valid


def _wmae_single_block_kernel(y_ref, p_ref, out_ref):
    """Whole problem in one VMEM block: compute, reduce, divide, done."""
    y = y_ref[...].astype(jnp.float32)
    p = p_ref[...].astype(jnp.float32)
    diff = jnp.abs(p - y)
    weight, valid = _weight_and_valid(y)
    wsum = jnp.sum(jnp.where(valid, diff * weight, 0.0))
    cnt = jnp.sum(valid.astype(jnp.float32))
    # NOTE: if no element falls in [EDGE[0], EDGE[-1]) this is NaN — same as
    # the PyTorch reference (sum([])/len([])).
    out_ref[0] = wsum / cnt


def _wmae_tiled_kernel(y_ref, p_ref, out_ref, accw_ref, accv_ref, *, total_rows):
    """Grid over row tiles; one-vreg VMEM accumulators, epilogue reduce."""
    i = pl.program_id(0)

    @pl.when(i == 0)
    def _():
        accw_ref[...] = jnp.zeros_like(accw_ref)
        accv_ref[...] = jnp.zeros_like(accv_ref)

    y = y_ref[...].astype(jnp.float32)
    p = p_ref[...].astype(jnp.float32)
    tile_rows = y.shape[0]

    # Mask rows beyond the real data (a ragged last tile reads undefined
    # values; jnp.where keeps any garbage/NaN out of the sums).
    row = jax.lax.broadcasted_iota(jnp.int32, y.shape, 0) + i * tile_rows
    in_bounds = row < total_rows

    diff = jnp.abs(p - y)
    weight, valid = _weight_and_valid(y)
    valid = valid & in_bounds

    # Sublane-reduce the tile first (VPU vreg adds), then touch only one vreg
    # of accumulator per quantity per step.
    pw = jnp.sum(jnp.where(valid, diff * weight, 0.0), axis=0, keepdims=True)
    pv = jnp.sum(valid.astype(jnp.float32), axis=0, keepdims=True)
    accw_ref[...] += pw
    accv_ref[...] += pv

    @pl.when(i == pl.num_programs(0) - 1)
    def _():
        out_ref[0] = jnp.sum(accw_ref[...]) / jnp.sum(accv_ref[...])


def wmae_loss(y, p, *, tile_rows=1024, single_block_max_rows=2048):
    """y, p: float arrays of identical shape (e.g. NCHW). Returns scalar loss."""
    assert y.shape == p.shape
    n = int(np.prod(y.shape))
    rows = -(-n // _LANES)  # ceil(n / 128)
    pad = rows * _LANES - n

    y_flat = y.reshape(-1)
    p_flat = p.reshape(-1)
    if pad:
        # Only the last partial lane-row needs padding (<128 elems). Sentinel
        # is outside [EDGE[0], EDGE[-1]) so padded elems are never selected.
        sentinel = float(EDGE[-1] + 1.0)
        y_flat = jnp.pad(y_flat, (0, pad), constant_values=sentinel)
        p_flat = jnp.pad(p_flat, (0, pad), constant_values=sentinel)
    y2 = y_flat.reshape(rows, _LANES)
    p2 = p_flat.reshape(rows, _LANES)

    if rows <= single_block_max_rows:
        # Single grid step: whole slab is one block (block == full array dims,
        # so no (8,128) divisibility requirement). No accumulator machinery.
        out = pl.pallas_call(
            _wmae_single_block_kernel,
            out_shape=jax.ShapeDtypeStruct((1,), jnp.float32),
            grid=(1,),
            in_specs=[
                pl.BlockSpec((rows, _LANES), lambda i: (0, 0)),
                pl.BlockSpec((rows, _LANES), lambda i: (0, 0)),
            ],
            out_specs=pl.BlockSpec(memory_space=pltpu.SMEM),
        )(y2, p2)
        return out[0]

    # Tiled path for large inputs. Keep tile_rows a multiple of 8 and no
    # larger than the (8-rounded) row count; 1024 f32 rows ≈ 512 KiB per input
    # buffer — safe on every generation incl. v7x's 64 MiB VMEM.
    rows8 = ((rows + 7) // 8) * 8
    tile_rows = int(min(tile_rows, rows8))
    tile_rows = ((tile_rows + 7) // 8) * 8
    num_tiles = -(-rows // tile_rows)

    kernel = functools.partial(_wmae_tiled_kernel, total_rows=rows)
    out = pl.pallas_call(
        kernel,
        out_shape=jax.ShapeDtypeStruct((1,), jnp.float32),
        grid=(num_tiles,),
        in_specs=[
            pl.BlockSpec((tile_rows, _LANES), lambda i: (i, 0)),
            pl.BlockSpec((tile_rows, _LANES), lambda i: (i, 0)),
        ],
        out_specs=pl.BlockSpec(memory_space=pltpu.SMEM),
        scratch_shapes=[
            pltpu.VMEM((1, _LANES), jnp.float32),
            pltpu.VMEM((1, _LANES), jnp.float32),
        ],
        compiler_params=pltpu.CompilerParams(
            dimension_semantics=("arbitrary",)),
    )(y2, p2)
    return out[0]


def wmae_loss_ref(y, p):
    """Pure-JAX reference mirroring the PyTorch forward (per-bin loop)."""
    y = y.astype(jnp.float32).reshape(-1)
    p = p.astype(jnp.float32).reshape(-1)
    diff = jnp.abs(p - y)
    wsum = jnp.float32(0.0)
    cnt = jnp.float32(0.0)
    for i in range(len(WEIGHTS)):
        mask = (y >= EDGE[i]) & (y < EDGE[i + 1])
        wsum = wsum + jnp.sum(jnp.where(mask, WEIGHTS[i] * diff, 0.0))
        cnt = cnt + jnp.sum(mask.astype(jnp.float32))
    return wsum / cnt


if __name__ == "__main__":
    key = jax.random.PRNGKey(0)
    k1, k2 = jax.random.split(key)
    shape = (2, 4, 16, 16)  # NCHW
    # y in [0, 1) so it spans the scaled bin edges; p = y + small noise.
    y = jax.random.uniform(k1, shape, dtype=jnp.float32, minval=0.0, maxval=1.0)
    p = y + 0.05 * jax.random.normal(k2, shape, dtype=jnp.float32)

    ref = wmae_loss_ref(y, p)

    # Primary (single-block fast) path.
    loss = wmae_loss(y, p)
    jax.block_until_ready(loss)
    np.testing.assert_allclose(np.asarray(loss), np.asarray(ref), rtol=1e-5, atol=1e-6)

    # Also exercise the multi-step tiled path (VMEM accumulators + epilogue).
    loss_tiled = wmae_loss(y, p, tile_rows=8, single_block_max_rows=0)
    jax.block_until_ready(loss_tiled)
    np.testing.assert_allclose(np.asarray(loss_tiled), np.asarray(ref), rtol=1e-5, atol=1e-6)

    print("KERNEL_OK")
</pallas_src>

<mosaic_0001>
module attributes {stable_mosaic.version = 11 : i64} {
  func.func @_wmae_single_block_kernel(%arg0: i32, %arg1: memref<16x128xf32, #tpu.memory_space<vmem>>, %arg2: memref<16x128xf32, #tpu.memory_space<vmem>>, %arg3: memref<1xf32, #tpu.memory_space<smem>>) attributes {dimension_semantics = [#tpu.dimension_semantics<arbitrary>], iteration_bounds = array<i64: 1>, scalar_prefetch = 0 : i64, scratch_operands = 0 : i64, tpu.core_type = #tpu.core_type<tc>, window_params = [{pipeline_mode = #tpu.pipeline_mode<synchronous>, transform_indices = @transform_0, window_bounds = array<i64: 16, 128>}, {pipeline_mode = #tpu.pipeline_mode<synchronous>, transform_indices = @transform_1, window_bounds = array<i64: 16, 128>}, {transform_indices = @transform_2, window_bounds = array<i64: 1>}]} {
    %c0 = arith.constant 0 : index
    %c0_0 = arith.constant 0 : index
    %0 = vector.load %arg1[%c0, %c0_0] : memref<16x128xf32, #tpu.memory_space<vmem>>, vector<16x128xf32>
    %c0_1 = arith.constant 0 : index
    %c0_2 = arith.constant 0 : index
    %1 = vector.load %arg2[%c0_1, %c0_2] : memref<16x128xf32, #tpu.memory_space<vmem>>, vector<16x128xf32>
    %2 = arith.subf %1, %0 : vector<16x128xf32>
    %3 = math.absf %2 : vector<16x128xf32>
    %cst = arith.constant 0.000000e+00 : f32
    %4 = vector.broadcast %cst : f32 to vector<16x128xf32>
    %5 = arith.cmpf oge, %0, %4 : vector<16x128xf32>
    %cst_3 = arith.constant 1.000000e+00 : f32
    %6 = vector.broadcast %cst_3 : f32 to vector<16x128xf32>
    %7 = arith.cmpf olt, %0, %6 : vector<16x128xf32>
    %8 = arith.andi %5, %7 : vector<16x128xi1>
    %cst_4 = arith.constant 0.000000e+00 : f32
    %9 = vector.broadcast %cst_4 : f32 to vector<16x128xf32>
    %cst_5 = arith.constant 1.000000e-01 : f32
    %10 = vector.broadcast %cst_5 : f32 to vector<16x128xf32>
    %11 = arith.cmpf oge, %0, %10 : vector<16x128xf32>
    %12 = arith.extui %11 : vector<16x128xi1> to vector<16x128xi32>
    %13 = arith.sitofp %12 : vector<16x128xi32> to vector<16x128xf32>
    %cst_6 = arith.constant 1.000000e+00 : f32
    %14 = vector.broadcast %cst_6 : f32 to vector<16x128xf32>
    %15 = arith.mulf %14, %13 : vector<16x128xf32>
    %16 = arith.addf %9, %15 : vector<16x128xf32>
    %cst_7 = arith.constant 2.000000e-01 : f32
    %17 = vector.broadcast %cst_7 : f32 to vector<16x128xf32>
    %18 = arith.cmpf oge, %0, %17 : vector<16x128xf32>
    %19 = arith.extui %18 : vector<16x128xi1> to vector<16x128xi32>
    %20 = arith.sitofp %19 : vector<16x128xi32> to vector<16x128xf32>
    %cst_8 = arith.constant 1.000000e+00 : f32
    %21 = vector.broadcast %cst_8 : f32 to vector<16x128xf32>
    %22 = arith.mulf %21, %20 : vector<16x128xf32>
    %23 = arith.addf %16, %22 : vector<16x128xf32>
    %cst_9 = arith.constant 3.000000e-01 : f32
    %24 = vector.broadcast %cst_9 : f32 to vector<16x128xf32>
    %25 = arith.cmpf oge, %0, %24 : vector<16x128xf32>
    %26 = arith.extui %25 : vector<16x128xi1> to vector<16x128xi32>
    %27 = arith.sitofp %26 : vector<16x128xi32> to vector<16x128xf32>
    %cst_10 = arith.constant 1.000000e+00 : f32
    %28 = vector.broadcast %cst_10 : f32 to vector<16x128xf32>
    %29 = arith.mulf %28, %27 : vector<16x128xf32>
    %30 = arith.addf %23, %29 : vector<16x128xf32>
    %cst_11 = arith.constant 4.000000e-01 : f32
    %31 = vector.broadcast %cst_11 : f32 to vector<16x128xf32>
    %32 = arith.cmpf oge, %0, %31 : vector<16x128xf32>
    %33 = arith.extui %32 : vector<16x128xi1> to vector<16x128xi32>
    %34 = arith.sitofp %33 : vector<16x128xi32> to vector<16x128xf32>
    %cst_12 = arith.constant 1.000000e+00 : f32
    %35 = vector.broadcast %cst_12 : f32 to vector<16x128xf32>
    %36 = arith.mulf %35, %34 : vector<16x128xf32>
    %37 = arith.addf %30, %36 : vector<16x128xf32>
    %cst_13 = arith.constant 5.000000e-01 : f32
    %38 = vector.broadcast %cst_13 : f32 to vector<16x128xf32>
    %39 = arith.cmpf oge, %0, %38 : vector<16x128xf32>
    %40 = arith.extui %39 : vector<16x128xi1> to vector<16x128xi32>
    %41 = arith.sitofp %40 : vector<16x128xi32> to vector<16x128xf32>
    %cst_14 = arith.constant 1.000000e+00 : f32
    %42 = vector.broadcast %cst_14 : f32 to vector<16x128xf32>
    %43 = arith.mulf %42, %41 : vector<16x128xf32>
    %44 = arith.addf %37, %43 : vector<16x128xf32>
    %45 = arith.mulf %3, %44 : vector<16x128xf32>
    %cst_15 = arith.constant 0.000000e+00 : f32
    %46 = vector.broadcast %cst_15 : f32 to vector<16x128xf32>
    %47 = arith.select %8, %45, %46 : vector<16x128xi1>, vector<16x128xf32>
    %48 = vector.shape_cast %47 : vector<16x128xf32> to vector<1x16x128xf32>
    %cst_16 = arith.constant dense<0.000000e+00> : vector<1xf32>
    %49 = vector.multi_reduction <add>, %48, %cst_16 [1, 2] : vector<1x16x128xf32> to vector<1xf32>
    %50 = vector.shape_cast %49 : vector<1xf32> to vector<1x1x1xf32>
    %51 = vector.extract %50[0, 0, 0] : f32 from vector<1x1x1xf32>
    %52 = arith.extui %8 : vector<16x128xi1> to vector<16x128xi32>
    %53 = arith.sitofp %52 : vector<16x128xi32> to vector<16x128xf32>
    %54 = vector.shape_cast %53 : vector<16x128xf32> to vector<1x16x128xf32>
    %cst_17 = arith.constant dense<0.000000e+00> : vector<1xf32>
    %55 = vector.multi_reduction <add>, %54, %cst_17 [1, 2] : vector<1x16x128xf32> to vector<1xf32>
    %56 = vector.shape_cast %55 : vector<1xf32> to vector<1x1x1xf32>
    %57 = vector.extract %56[0, 0, 0] : f32 from vector<1x1x1xf32>
    %58 = arith.divf %51, %57 : f32
    %c0_18 = arith.constant 0 : index
    %59 = memref.load %arg3[%c0_18] : memref<1xf32, #tpu.memory_space<smem>>
    memref.store %58, %arg3[%c0_18] : memref<1xf32, #tpu.memory_space<smem>>
    return
  }
  func.func @transform_0(%arg0: i32) -> (i32, i32) {
    %c0_i32 = arith.constant 0 : i32
    %c0_i32_0 = arith.constant 0 : i32
    %c0_i32_1 = arith.constant 0 : i32
    return %c0_i32, %c0_i32_0 : i32, i32
  }
  func.func @transform_1(%arg0: i32) -> (i32, i32) {
    %c0_i32 = arith.constant 0 : i32
    %c0_i32_0 = arith.constant 0 : i32
    %c0_i32_1 = arith.constant 0 : i32
    return %c0_i32, %c0_i32_0 : i32, i32
  }
  func.func @transform_2(%arg0: i32) -> i32 {
    %c0_i32 = arith.constant 0 : i32
    %c0_i32_0 = arith.constant 0 : i32
    return %c0_i32 : i32
  }
}

</mosaic_0001>

<bundles_post_ra>
// kernel: tpu_custom_call.1
= control target key start
LH: loop header
LB: loop body
LE: loop exit
PB: predicated region body
PF: predicated region fallthrough
CT: control target
= control target key end

     0   :  { %7 = vsyncpa [#allocation3], 0  ;;  %s287_s0 = inlined_call_operand.hbm [shape: f32[16,128], index: 0, kind: input, shape index: {}]   ;;  %s288_s1 = inlined_call_operand.hbm [shape: f32[16,128], index: 1, kind: input, shape index: {}]   ;;  %s289_s2 = inlined_call_operand.hbm [shape: f32[1], index: 2, kind: output, shape index: {}]  }
   0x1   :  { %8 = vsyncpa [#allocation6], 0 }
   0x2   :  { %9 = vsyncpa [#allocation4], 0  ;;  %s229_s9 = smov [#allocation2]   ;;  %s169_s13 = scalar_lea.hbm %s287_s0, 256 }
   0x3   :  { %s15_s10 = sshll.u32 %s229_s9, 4  ;;  %p170_p0 = scmp.ne.s32.totalorder %s287_s0, %s169_s13  ;;  %s16_s10 = int_to_ptr.vmem [resolvable:$true] %s15_s10 }
   0x4   :  { %p173_p1 = scmp.lt.u32.totalorder %s169_s13, %s287_s0 }
   0x6   :  { %p175_p2 = pnand %p173_p1, %p170_p0 }
   0x8   :  { %178 = shalt.err (!%p175_p2)
}
   0x9   :  { %s179_s18 = scalar_lea.vmem %s16_s10, 256  ;;  %p184_p4 = scmp.lt.s32.totalorder %s16_s10, %s16_s10 }
   0xa   :  { %p180_p3 = scmp.ne.s32.totalorder %s16_s10, %s179_s18  ;;  %p185_p5 = scmp.lt.s32.totalorder %s179_s18, %s179_s18 }
   0xc   :  { %p186_p6 = por %p185_p5, %p184_p4 }
   0xe   :  { %p187_p7 = pnand %p186_p6, %p180_p3 }
  0x10   :  { %190 = shalt.err (!%p187_p7)
}
  0x11   :  { %s230_s19 = smov 128   ;;  %s231_s20 = smov 8  }
  0x12   :  { %21 = dma.hbm_to_vmem [thread:$0]  %s287_s0, 256, %s16_s10, [#allocation3], %s230_s19, %s230_s19, %s231_s20  }
  0x13   :  { %s232_s23 = smov [#allocation5]   ;;  %s191_s27 = scalar_lea.hbm %s288_s1, 256 }
  0x14   :  { %s27_s24 = sshll.u32 %s232_s23, 4  ;;  %p192_p8 = scmp.ne.s32.totalorder %s288_s1, %s191_s27  ;;  %s28_s24 = int_to_ptr.vmem [resolvable:$true] %s27_s24 }
  0x15   :  { %p195_p9 = scmp.lt.u32.totalorder %s191_s27, %s288_s1 }
  0x17   :  { %p197_p10 = pnand %p195_p9, %p192_p8 }
  0x19   :  { %200 = shalt.err (!%p197_p10)
}
  0x1a   :  { %s201_s4 = scalar_lea.vmem %s28_s24, 256  ;;  %p206_p12 = scmp.lt.s32.totalorder %s28_s24, %s28_s24 }
  0x1b   :  { %p202_p11 = scmp.ne.s32.totalorder %s28_s24, %s201_s4  ;;  %p207_p13 = scmp.lt.s32.totalorder %s201_s4, %s201_s4 }
  0x1d   :  { %p208_p0 = por %p207_p13, %p206_p12 }
  0x1f   :  { %p209_p1 = pnand %p208_p0, %p202_p11 }
  0x21   :  { %212 = shalt.err (!%p209_p1)
}
  0x22   :  { %33 = dma.hbm_to_vmem [thread:$0]  %s288_s1, 256, %s28_s24, [#allocation6], %s230_s19, %s230_s19, %s231_s20  }
  0x23   :  { %223 = dma.done.wait [#allocation3], 256  }
  0x24   :  { %224 = vsyncadd [#allocation3], 4294967040 }
  0x25   :  { %225 = dma.done.wait [#allocation6], 256  }
  0x26   :  { %226 = vsyncadd [#allocation6], 4294967040  ;;  %v40_v0 = vld [vmem:[#allocation2] sm:$0xff]  ;;  %v41_v1 = vld [vmem:[#allocation2 + $0x8] sm:$0xff]  ;;  %v233_v5 = vmov 0.0   ;;  %s213_s11 = scalar_lea.hbm %s289_s2, 16 }
  0x27   :  { %v42_v2 = vld [vmem:[#allocation5] sm:$0xff]  ;;  %v43_v3 = vld [vmem:[#allocation5 + $0x8] sm:$0xff]  ;;  %vm54_vm0 = vcmp.ge.f32.partialorder %v40_v0, 0.1  ;;  %vm55_vm1 = vcmp.ge.f32.partialorder %v41_v1, 0.1  ;;  %p214_p2 = scmp.ne.s32.totalorder %s289_s2, %s213_s11  ;;  %p217_p3 = scmp.lt.u32.totalorder %s213_s11, %s289_s2 }
  0x28   :  { %v44_v4 = vsub.f32 %v42_v2, %v40_v0  ;;  %v143_v6 = vsel %vm54_vm0, 1.0, %v233_v5  ;;  %v144_v7 = vsel %vm55_vm1, 1.0, %v233_v5  ;;  %vm62_vm2 = vcmp.ge.f32.partialorder %v40_v0, 0.2 }
  0x29   :  { %v45_v8 = vsub.f32 %v43_v3, %v41_v1  ;;  %vm63_vm3 = vcmp.ge.f32.partialorder %v41_v1, 0.2  ;;  %v145_v9 = vsel %vm62_vm2, 1.0, %v233_v5  ;;  %vm86_vm4 = vcmp.ge.f32.partialorder %v40_v0, 0.5  ;;  %p219_p4 = pnand %p217_p3, %p214_p2 }
  0x2a   :  { %v146_v10 = vsel %vm63_vm3, 1.0, %v233_v5  ;;  %v68_v11 = vadd.f32 %v145_v9, %v143_v6  ;;  %vm70_vm5 = vcmp.ge.f32.partialorder %v40_v0, 0.3  ;;  %vm71_vm6 = vcmp.ge.f32.partialorder %v41_v1, 0.3 }
  0x2b   :  { %v69_v12 = vadd.f32 %v146_v10, %v144_v7  ;;  %v147_v13 = vsel %vm70_vm5, 1.0, %v233_v5  ;;  %v148_v14 = vsel %vm71_vm6, 1.0, %v233_v5  ;;  %vm78_vm7 = vcmp.ge.f32.partialorder %v40_v0, 0.4 }
  0x2c   :  { %v76_v15 = vadd.f32 %v147_v13, %v68_v11  ;;  %vm79_vm8 = vcmp.ge.f32.partialorder %v41_v1, 0.4  ;;  %v149_v16 = vsel %vm78_vm7, 1.0, %v233_v5  ;;  %vm87_vm9 = vcmp.ge.f32.partialorder %v41_v1, 0.5 }
  0x2d   :  { %vm48_vm10 = vcmp.ge.f32.partialorder %v40_v0, 0.0  ;;  %v77_v17 = vadd.f32 %v148_v14, %v69_v12  ;;  %v150_v18 = vsel %vm79_vm8, 1.0, %v233_v5  ;;  %v151_v19 = vsel %vm86_vm4, 1.0, %v233_v5 }
  0x2e   :  { %v46_v20 = vand.u32 2147483647, %v44_v4  ;;  %vm50_vm11 = vcmp.lt.f32.partialorder %v40_v0, 1.0  ;;  %v84_v21 = vadd.f32 %v149_v16, %v76_v15  ;;  %v152_v22 = vsel %vm87_vm9, 1.0, %v233_v5 }
  0x2f   :  { %v47_v23 = vand.u32 2147483647, %v45_v8  ;;  %vm49_vm12 = vcmp.ge.f32.partialorder %v41_v1, 0.0  ;;  %vm51_vm13 = vcmp.lt.f32.partialorder %v41_v1, 1.0  ;;  %v85_v24 = vadd.f32 %v150_v18, %v77_v17  ;;  %vm52_vm14 = vmand %vm48_vm10, %vm50_vm11 }
  0x30   :  { %v92_v25 = vadd.f32 %v151_v19, %v84_v21  ;;  %vm53_vm15 = vmand %vm49_vm12, %vm51_vm13  ;;  %v153_v31 = vsel %vm52_vm14, 1.0, %v233_v5 }
  0x31   :  { %v93_v26 = vadd.f32 %v152_v22, %v85_v24  ;;  %v154_v32 = vsel %vm53_vm15, 1.0, %v233_v5 }
  0x32   :  { %v94_v27 = vmul.f32 %v92_v25, %v46_v20  ;;  %v112_v34 = vadd.f32 %v154_v32, %v153_v31 }
  0x33   :  { %v95_v28 = vmul.f32 %v93_v26, %v47_v23 }
  0x34   :  { %v96_v29 = vsel %vm52_vm14, %v94_v27, 0.0 }
  0x35   :  { %v97_v30 = vsel %vm53_vm15, %v95_v28, 0.0 }
  0x36   :  { %v98_v33 = vadd.f32 %v97_v30, %v96_v29 }
  0x38   :  { %99 = vadd.xlane.f32.xlu0 %v98_v33 }
  0x3c   :  { %113 = vadd.xlane.f32.xlu0 %v112_v34 }
  0xc5   :  { %v100_v35 = vpop.xlane.xlu0 %99 }
  0xc6   :  { %v101_v36 = vrot.slane %v100_v35, 4 }
  0xc8   :  { %v102_v37 = vadd.f32 %v101_v36, %v100_v35 }
  0xc9   :  { %v114_v38 = vpop.xlane.xlu0 %113 }
  0xca   :  { %v103_v39 = vrot.slane %v102_v37, 2  ;;  %v115_v40 = vrot.slane %v114_v38, 4 }
  0xcc   :  { %v116_v41 = vadd.f32 %v115_v40, %v114_v38  ;;  %v104_v42 = vadd.f32 %v103_v39, %v102_v37 }
  0xce   :  { %v117_v43 = vrot.slane %v116_v41, 2  ;;  %v105_v44 = vrot.slane %v104_v42, 1 }
  0xd0   :  { %v118_v45 = vadd.f32 %v117_v43, %v116_v41  ;;  %v106_v46 = vadd.f32 %v105_v44, %v104_v42 }
  0xd2   :  { %155 = vpush %v106_v46  ;;  %v119_v47 = vrot.slane %v118_v45, 1 }
  0xd4   :  { %v120_v48 = vadd.f32 %v119_v47, %v118_v45 }
  0xd6   :  { %157 = vpush %v120_v48 }
 0x103   :  { %s156_s1 = spop %155 }
 0x107   :  { %s158_s6 = spop %157 }
 0x108   :  { %v122_v49 = vstv %s158_s6 }
 0x109   :  { %167 = vrcp.f32 %v122_v49 }
 0x113   :  { %v168_v50 = vpop.eup %167 }
 0x114   :  { %159 = vpush %v168_v50 }
 0x145   :  { %s160_s7 = spop %159 }
 0x146   :  { %s125_s8 = smul.f32 %s160_s7, %s156_s1 }
 0x148   :  { %127 = sst [smem:[#allocation7]] %s125_s8 }
 0x149   :  { %222 = shalt.err (!%p219_p4)
}
 0x14a   :  { %s234_s16 = smov [#allocation7]  }
 0x14b   :  { %135 = dma.smem_to_hbm %s234_s16, 16, %s289_s2, [#allocation4]  }
 0x14c   :  { %227 = dma.done.wait [#allocation4], 16  }
 0x14d   :  { %228 = vsyncadd [#allocation4], 4294967280 }
 0x14e   :  { %139 = sfence }
 0x14f   :  { %140 = vsyncpa [#allocation3], 1 }
 0x150   :  { %141 = vsyncpa [#allocation6], 1 }
 0x151   :  { %142 = vsyncpa [#allocation4], 1 }

</bundles_post_ra>
